<compile_context>
chip_gen: v6e
topology: v6e:2x2x1
jax: 0.10.0
libtpu: 0.0.40
codegen_flags: <defaults>
</compile_context>

<pallas_src>
import math
import functools

import jax
import jax.numpy as jnp
from jax import lax
from jax.experimental import pallas as pl
from jax.experimental.pallas import tpu as pltpu


# Finite mask sentinel (no inf-inf NaN in online softmax). Plain Python float so
# it lowers as a literal and is NOT captured as a traced constant by Pallas.
_NEG_BIG = -1e30


def _pick_tile(total, target):
    """Largest tile <= target that divides `total` and is 8-aligned (or == total)."""
    if total <= target:
        return total
    for t in range(target, 0, -1):
        if total % t == 0 and (t % 8 == 0 or t == total):
            return t
    return total


# ---------------------------------------------------------------------------
# Kernel A: fused, head-split QKV projection (c_attn)
# ---------------------------------------------------------------------------
def _qkv_proj_kernel(x_ref, wq_ref, wk_ref, wv_ref, bq_ref, bk_ref, bv_ref,
                     qo_ref, ko_ref, vo_ref, *, compute_dtype):
    x = x_ref[0].astype(compute_dtype)                                   # (Tt, C)
    q = jnp.dot(x, wq_ref[0], preferred_element_type=jnp.float32) + bq_ref[0]
    k = jnp.dot(x, wk_ref[0], preferred_element_type=jnp.float32) + bk_ref[0]
    v = jnp.dot(x, wv_ref[0], preferred_element_type=jnp.float32) + bv_ref[0]
    qo_ref[0, 0] = q.astype(qo_ref.dtype)                                # (Tt, hd)
    ko_ref[0, 0] = k.astype(ko_ref.dtype)
    vo_ref[0, 0] = v.astype(vo_ref.dtype)


# ---------------------------------------------------------------------------
# Kernel B: flash causal attention over key blocks + fused c_proj epilogue
# ---------------------------------------------------------------------------
def _flash_attn_proj_kernel(q_ref, k_ref, v_ref, wp_ref, bp_ref, o_ref,
                            m_scr, l_scr, acc_scr, *, tq, tk, compute_dtype):
    qi = pl.program_id(1)
    ki = pl.program_id(2)
    nk = pl.num_programs(2)

    @pl.when(ki == 0)
    def _init():
        m_scr[...] = jnp.full_like(m_scr, _NEG_BIG)
        l_scr[...] = jnp.zeros_like(l_scr)
        acc_scr[...] = jnp.zeros_like(acc_scr)

    # Causal block skip: only touch key blocks that intersect the causal region.
    @pl.when(ki * tk <= qi * tq + (tq - 1))
    def _compute():
        q = q_ref[0]                                   # (H, TQ, hd) — scale pre-folded
        k = k_ref[0]                                   # (H, TK, hd)
        v = v_ref[0]                                   # (H, TK, hd)

        # Batched QK^T over heads; contraction on last axes (no k transpose).
        s = jnp.einsum('hqd,hkd->hqk', q, k,
                       preferred_element_type=jnp.float32)        # (H, TQ, TK) f32

        n_head = s.shape[0]
        row = lax.broadcasted_iota(jnp.int32, (n_head, tq, tk), 1) + qi * tq
        col = lax.broadcasted_iota(jnp.int32, (n_head, tq, tk), 2) + ki * tk
        s = jnp.where(row >= col, s, _NEG_BIG)

        m_prev = m_scr[...]                                        # (H, TQ, 1)
        m_new = jnp.maximum(m_prev, jnp.max(s, axis=-1, keepdims=True))
        alpha = jnp.exp(m_prev - m_new)
        p = jnp.exp(s - m_new)                                     # (H, TQ, TK) f32
        l_scr[...] = alpha * l_scr[...] + jnp.sum(p, axis=-1, keepdims=True)
        pv = jnp.einsum('hqk,hkd->hqd', p.astype(compute_dtype), v,
                        preferred_element_type=jnp.float32)        # (H, TQ, hd)
        acc_scr[...] = alpha * acc_scr[...] + pv
        m_scr[...] = m_new

    @pl.when(ki == nk - 1)
    def _finalize():
        att = acc_scr[...] * pl.reciprocal(l_scr[...], approx=True)   # (H, TQ, hd)
        # Fused c_proj: concat over heads is never materialized —
        # y = sum_h att_h @ Wproj[h*hd:(h+1)*hd, :]  + bias
        y = jnp.einsum('hqd,hdc->hqc', att.astype(compute_dtype), wp_ref[...],
                       preferred_element_type=jnp.float32)            # (H, TQ, C)
        y = jnp.sum(y, axis=0) + bp_ref[...]                          # (TQ, C)
        o_ref[0] = y.astype(o_ref.dtype)


# ---------------------------------------------------------------------------
# Wrapper
# ---------------------------------------------------------------------------
def causal_self_attention(x, w_attn, b_attn, w_proj, b_proj, n_head, *,
                          compute_dtype=jnp.bfloat16,
                          q_tile=256, k_tile=256, proj_tile=256,
                          vmem_limit_bytes=48 * 1024 * 1024):
    """y = c_proj(causal_sdpa(split_heads(c_attn(x)))); x: (B, T, C)."""
    B, T, C = x.shape
    assert C % n_head == 0, "n_embd must be divisible by n_head"
    hd = C // n_head

    # Generation-safe tile defaults (<=256); re-derive/raise for v6e if desired.
    tt = _pick_tile(T, proj_tile)
    tq = _pick_tile(T, q_tile)
    tk = _pick_tile(T, k_tile)

    scale = 1.0 / math.sqrt(hd)

    # Host-side (one-time) weight re-layouts: split QKV, group columns per head,
    # fold 1/sqrt(hd) into the Q projection, cast matmul operands to bf16.
    w_attn = w_attn.astype(jnp.float32)
    b_attn = b_attn.astype(jnp.float32)
    wq = (w_attn[:, 0 * C:1 * C] * scale).reshape(C, n_head, hd).transpose(1, 0, 2)
    wk = w_attn[:, 1 * C:2 * C].reshape(C, n_head, hd).transpose(1, 0, 2)
    wv = w_attn[:, 2 * C:3 * C].reshape(C, n_head, hd).transpose(1, 0, 2)
    wq, wk, wv = (w.astype(compute_dtype) for w in (wq, wk, wv))
    bq = (b_attn[0 * C:1 * C] * scale).reshape(n_head, 1, hd)
    bk = b_attn[1 * C:2 * C].reshape(n_head, 1, hd)
    bv = b_attn[2 * C:3 * C].reshape(n_head, 1, hd)

    wp = w_proj.astype(jnp.float32).reshape(n_head, hd, C).astype(compute_dtype)
    bp = b_proj.astype(jnp.float32).reshape(1, C)

    cparams_a = pltpu.CompilerParams(
        dimension_semantics=("parallel", "parallel", "parallel"),
        vmem_limit_bytes=vmem_limit_bytes)
    cparams_b = pltpu.CompilerParams(
        dimension_semantics=("parallel", "parallel", "arbitrary"),
        vmem_limit_bytes=vmem_limit_bytes)

    # ---- Kernel A: QKV projection, head-major bf16 outputs ----
    qkv_shape = jax.ShapeDtypeStruct((B, n_head, T, hd), compute_dtype)
    param_spec = lambda shp: pl.BlockSpec(shp, lambda b, t, h: (h, 0, 0))
    # TODO(synk): constant-index weight blocks could be single-buffered
    # (pipeline_mode=pl.Buffered(1)) to halve their VMEM; left at default here.
    q_hm, k_hm, v_hm = pl.pallas_call(
        functools.partial(_qkv_proj_kernel, compute_dtype=compute_dtype),
        out_shape=(qkv_shape, qkv_shape, qkv_shape),
        grid_spec=pltpu.PrefetchScalarGridSpec(
            num_scalar_prefetch=0,
            grid=(B, T // tt, n_head),
            in_specs=[
                pl.BlockSpec((1, tt, C), lambda b, t, h: (b, t, 0)),
                param_spec((1, C, hd)), param_spec((1, C, hd)), param_spec((1, C, hd)),
                param_spec((1, 1, hd)), param_spec((1, 1, hd)), param_spec((1, 1, hd)),
            ],
            out_specs=[
                pl.BlockSpec((1, 1, tt, hd), lambda b, t, h: (b, h, t, 0)),
                pl.BlockSpec((1, 1, tt, hd), lambda b, t, h: (b, h, t, 0)),
                pl.BlockSpec((1, 1, tt, hd), lambda b, t, h: (b, h, t, 0)),
            ],
        ),
        compiler_params=cparams_a,
    )(x, wq, wk, wv, bq, bk, bv)

    # ---- Kernel B: flash causal attention + fused output projection ----
    out = pl.pallas_call(
        functools.partial(_flash_attn_proj_kernel, tq=tq, tk=tk,
                          compute_dtype=compute_dtype),
        out_shape=jax.ShapeDtypeStruct((B, T, C), x.dtype),
        grid_spec=pltpu.PrefetchScalarGridSpec(
            num_scalar_prefetch=0,
            grid=(B, T // tq, T // tk),
            in_specs=[
                pl.BlockSpec((1, n_head, tq, hd), lambda b, qi, ki: (b, 0, qi, 0)),
                pl.BlockSpec((1, n_head, tk, hd), lambda b, qi, ki: (b, 0, ki, 0)),
                pl.BlockSpec((1, n_head, tk, hd), lambda b, qi, ki: (b, 0, ki, 0)),
                pl.BlockSpec((n_head, hd, C), lambda b, qi, ki: (0, 0, 0)),
                pl.BlockSpec((1, C), lambda b, qi, ki: (0, 0)),
            ],
            out_specs=pl.BlockSpec((1, tq, C), lambda b, qi, ki: (b, qi, 0)),
            scratch_shapes=[
                pltpu.VMEM((n_head, tq, 1), jnp.float32),   # running max m
                pltpu.VMEM((n_head, tq, 1), jnp.float32),   # running sum l
                pltpu.VMEM((n_head, tq, hd), jnp.float32),  # output accumulator
            ],
        ),
        compiler_params=cparams_b,
    )(q_hm, k_hm, v_hm, wp, bp)
    return out


# ---------------------------------------------------------------------------
# Pure-JAX f32 reference (mirrors the PyTorch module exactly)
# ---------------------------------------------------------------------------
def causal_self_attention_ref(x, w_attn, b_attn, w_proj, b_proj, n_head):
    B, T, C = x.shape
    hd = C // n_head
    qkv = x @ w_attn + b_attn
    q, k, v = jnp.split(qkv, 3, axis=-1)
    rs = lambda a: a.reshape(B, T, n_head, hd).transpose(0, 2, 1, 3)
    q, k, v = map(rs, (q, k, v))
    s = jnp.einsum('bhqd,bhkd->bhqk', q, k) / math.sqrt(hd)
    mask = jnp.tril(jnp.ones((T, T), bool))
    s = jnp.where(mask, s, -jnp.inf)
    p = jax.nn.softmax(s, axis=-1)
    y = jnp.einsum('bhqk,bhkd->bhqd', p, v).transpose(0, 2, 1, 3).reshape(B, T, C)
    return y @ w_proj + b_proj


if __name__ == "__main__":
    B, T, C, n_head = 2, 8, 32, 4
    key = jax.random.PRNGKey(0)
    keys = jax.random.split(key, 8)

    x = jax.random.normal(keys[0], (B, T, C), jnp.float32)

    std = 0.02
    w_attn = std * jax.random.normal(keys[1], (C, 3 * C), jnp.float32)   # c_attn weight (in, out)
    b_attn = std * jax.random.normal(keys[2], (3 * C,), jnp.float32)     # c_attn bias
    w_proj = std * jax.random.normal(keys[3], (C, C), jnp.float32)       # c_proj weight (in, out)
    b_proj = std * jax.random.normal(keys[4], (C,), jnp.float32)         # c_proj bias

    fn = jax.jit(causal_self_attention, static_argnames=("n_head",))
    out = fn(x, w_attn, b_attn, w_proj, b_proj, n_head=n_head)
    out = jax.block_until_ready(out)

    ref = causal_self_attention_ref(x, w_attn, b_attn, w_proj, b_proj, n_head)
    assert out.shape == (B, T, C)
    # bf16 MXU inputs (f32 accumulation) => compare with a bf16-appropriate tolerance.
    assert jnp.allclose(out, ref, atol=2e-2, rtol=2e-2), "mismatch vs reference"

    print("KERNEL_OK")
</pallas_src>

<mosaic_0001>
module attributes {stable_mosaic.version = 11 : i64} {
  func.func @_flash_attn_proj_kernel(%arg0: i32, %arg1: i32, %arg2: i32, %arg3: memref<1x4x8x8xbf16, #tpu.memory_space<vmem>>, %arg4: memref<1x4x8x8xbf16, #tpu.memory_space<vmem>>, %arg5: memref<1x4x8x8xbf16, #tpu.memory_space<vmem>>, %arg6: memref<4x8x32xbf16, #tpu.memory_space<vmem>>, %arg7: memref<1x32xf32, #tpu.memory_space<vmem>>, %arg8: memref<1x8x32xf32, #tpu.memory_space<vmem>>, %arg9: memref<4x8x1xf32, #tpu.memory_space<vmem>>, %arg10: memref<4x8x1xf32, #tpu.memory_space<vmem>>, %arg11: memref<4x8x8xf32, #tpu.memory_space<vmem>>) attributes {dimension_semantics = [#tpu.dimension_semantics<parallel>, #tpu.dimension_semantics<parallel>, #tpu.dimension_semantics<arbitrary>], iteration_bounds = array<i64: 2, 1, 1>, scalar_prefetch = 0 : i64, scratch_operands = 3 : i64, tpu.core_type = #tpu.core_type<tc>, window_params = [{transform_indices = @transform_0, window_bounds = array<i64: 1, 4, 8, 8>}, {transform_indices = @transform_1, window_bounds = array<i64: 1, 4, 8, 8>}, {transform_indices = @transform_2, window_bounds = array<i64: 1, 4, 8, 8>}, {pipeline_mode = #tpu.pipeline_mode<synchronous>, transform_indices = @transform_3, window_bounds = array<i64: 4, 8, 32>}, {pipeline_mode = #tpu.pipeline_mode<synchronous>, transform_indices = @transform_4, window_bounds = array<i64: 1, 32>}, {transform_indices = @transform_5, window_bounds = array<i64: 1, 8, 32>}]} {
    %c0_i32 = arith.constant 0 : i32
    %0 = arith.cmpi eq, %arg2, %c0_i32 : i32
    %1 = arith.extui %0 : i1 to i32
    %c0_i32_0 = arith.constant 0 : i32
    %2 = arith.cmpi ne, %1, %c0_i32_0 : i32
    scf.if %2 {
      %cst = arith.constant -1.000000e+30 : f32
      %12 = vector.broadcast %cst : f32 to vector<4x8x1xf32>
      %c0 = arith.constant 0 : index
      %c0_5 = arith.constant 0 : index
      %c0_6 = arith.constant 0 : index
      %13 = vector.load %arg9[%c0, %c0_5, %c0_6] : memref<4x8x1xf32, #tpu.memory_space<vmem>>, vector<4x8x1xf32>
      tpu.vector_store %arg9[%c0, %c0_5, %c0_6], %12 {strides = array<i32>} : memref<4x8x1xf32, #tpu.memory_space<vmem>>, vector<4x8x1xf32>,
      %cst_7 = arith.constant 0.000000e+00 : f32
      %14 = vector.broadcast %cst_7 : f32 to vector<4x8x1xf32>
      %c0_8 = arith.constant 0 : index
      %c0_9 = arith.constant 0 : index
      %c0_10 = arith.constant 0 : index
      %15 = vector.load %arg10[%c0_8, %c0_9, %c0_10] : memref<4x8x1xf32, #tpu.memory_space<vmem>>, vector<4x8x1xf32>
      tpu.vector_store %arg10[%c0_8, %c0_9, %c0_10], %14 {strides = array<i32>} : memref<4x8x1xf32, #tpu.memory_space<vmem>>, vector<4x8x1xf32>,
      %cst_11 = arith.constant 0.000000e+00 : f32
      %16 = vector.broadcast %cst_11 : f32 to vector<4x8x8xf32>
      %c0_12 = arith.constant 0 : index
      %c0_13 = arith.constant 0 : index
      %c0_14 = arith.constant 0 : index
      %17 = vector.load %arg11[%c0_12, %c0_13, %c0_14] : memref<4x8x8xf32, #tpu.memory_space<vmem>>, vector<4x8x8xf32>
      tpu.vector_store %arg11[%c0_12, %c0_13, %c0_14], %16 {strides = array<i32>} : memref<4x8x8xf32, #tpu.memory_space<vmem>>, vector<4x8x8xf32>,
    } else {
    }
    %c8_i32 = arith.constant 8 : i32
    %3 = arith.muli %arg2, %c8_i32 : i32
    %c8_i32_1 = arith.constant 8 : i32
    %4 = arith.muli %arg1, %c8_i32_1 : i32
    %c7_i32 = arith.constant 7 : i32
    %5 = arith.addi %4, %c7_i32 : i32
    %6 = arith.cmpi sle, %3, %5 : i32
    %7 = arith.extui %6 : i1 to i32
    %c0_i32_2 = arith.constant 0 : i32
    %8 = arith.cmpi ne, %7, %c0_i32_2 : i32
    scf.if %8 {
      %c0 = arith.constant 0 : index
      %c0_5 = arith.constant 0 : index
      %c0_6 = arith.constant 0 : index
      %c0_7 = arith.constant 0 : index
      %12 = vector.load %arg3[%c0, %c0_5, %c0_6, %c0_7] : memref<1x4x8x8xbf16, #tpu.memory_space<vmem>>, vector<1x4x8x8xbf16>
      %13 = vector.shape_cast %12 : vector<1x4x8x8xbf16> to vector<4x8x8xbf16>
      %c0_8 = arith.constant 0 : index
      %c0_9 = arith.constant 0 : index
      %c0_10 = arith.constant 0 : index
      %c0_11 = arith.constant 0 : index
      %14 = vector.load %arg4[%c0_8, %c0_9, %c0_10, %c0_11] : memref<1x4x8x8xbf16, #tpu.memory_space<vmem>>, vector<1x4x8x8xbf16>
      %15 = vector.shape_cast %14 : vector<1x4x8x8xbf16> to vector<4x8x8xbf16>
      %c0_12 = arith.constant 0 : index
      %c0_13 = arith.constant 0 : index
      %c0_14 = arith.constant 0 : index
      %c0_15 = arith.constant 0 : index
      %16 = vector.load %arg5[%c0_12, %c0_13, %c0_14, %c0_15] : memref<1x4x8x8xbf16, #tpu.memory_space<vmem>>, vector<1x4x8x8xbf16>
      %17 = vector.shape_cast %16 : vector<1x4x8x8xbf16> to vector<4x8x8xbf16>
      "tpu.trace_start"() <{level = 10 : i32, message = "hqd,hkd->hqk"}> : () -> ()
      %cst = arith.constant dense<0.000000e+00> : vector<4x8x8xf32>
      %18 = tpu.matmul %13, %15, %cst {dimension_numbers = #tpu.dot_dimension_numbers<[2], [2], [1], [1], [0, 0, 0, 1, 1, 1], [0], [0]>} : vector<4x8x8xbf16>, vector<4x8x8xbf16>, vector<4x8x8xf32> -> vector<4x8x8xf32>
      "tpu.trace_stop"() : () -> ()
      %19 = tpu.iota {dimensions = array<i32: 1>} : vector<4x8x8xi32>
      %c8_i32_16 = arith.constant 8 : i32
      %20 = arith.muli %arg1, %c8_i32_16 : i32
      %21 = vector.broadcast %20 : i32 to vector<4x8x8xi32>
      %22 = arith.addi %19, %21 : vector<4x8x8xi32>
      %23 = tpu.iota {dimensions = array<i32: 2>} : vector<4x8x8xi32>
      %c8_i32_17 = arith.constant 8 : i32
      %24 = arith.muli %arg2, %c8_i32_17 : i32
      %25 = vector.broadcast %24 : i32 to vector<4x8x8xi32>
      %26 = arith.addi %23, %25 : vector<4x8x8xi32>
      %27 = arith.cmpi sge, %22, %26 : vector<4x8x8xi32>
      %cst_18 = arith.constant -1.000000e+30 : f32
      %28 = vector.broadcast %cst_18 : f32 to vector<4x8x8xf32>
      %29 = arith.select %27, %18, %28 : vector<4x8x8xi1>, vector<4x8x8xf32>
      %c0_19 = arith.constant 0 : index
      %c0_20 = arith.constant 0 : index
      %c0_21 = arith.constant 0 : index
      %30 = vector.load %arg9[%c0_19, %c0_20, %c0_21] : memref<4x8x1xf32, #tpu.memory_space<vmem>>, vector<4x8x1xf32>
      %cst_22 = arith.constant dense<0xFF800000> : vector<4x8xf32>
      %31 = vector.multi_reduction <maximumf>, %29, %cst_22 [2] : vector<4x8x8xf32> to vector<4x8xf32>
      %32 = vector.shape_cast %31 : vector<4x8xf32> to vector<4x8x1xf32>
      %33 = arith.maximumf %30, %32 : vector<4x8x1xf32>
      %34 = arith.subf %30, %33 : vector<4x8x1xf32>
      %35 = math.exp %34 : vector<4x8x1xf32>
      %36 = vector.broadcast %33 : vector<4x8x1xf32> to vector<4x8x8xf32>
      %37 = arith.subf %29, %36 : vector<4x8x8xf32>
      %38 = math.exp %37 : vector<4x8x8xf32>
      %c0_23 = arith.constant 0 : index
      %c0_24 = arith.constant 0 : index
      %c0_25 = arith.constant 0 : index
      %39 = vector.load %arg10[%c0_23, %c0_24, %c0_25] : memref<4x8x1xf32, #tpu.memory_space<vmem>>, vector<4x8x1xf32>
      %40 = arith.mulf %35, %39 : vector<4x8x1xf32>
      %cst_26 = arith.constant dense<0.000000e+00> : vector<4x8xf32>
      %41 = vector.multi_reduction <add>, %38, %cst_26 [2] : vector<4x8x8xf32> to vector<4x8xf32>
      %42 = vector.shape_cast %41 : vector<4x8xf32> to vector<4x8x1xf32>
      %43 = arith.addf %40, %42 : vector<4x8x1xf32>
      %c0_27 = arith.constant 0 : index
      %c0_28 = arith.constant 0 : index
      %c0_29 = arith.constant 0 : index
      %44 = vector.load %arg10[%c0_27, %c0_28, %c0_29] : memref<4x8x1xf32, #tpu.memory_space<vmem>>, vector<4x8x1xf32>
      tpu.vector_store %arg10[%c0_27, %c0_28, %c0_29], %43 {strides = array<i32>} : memref<4x8x1xf32, #tpu.memory_space<vmem>>, vector<4x8x1xf32>,
      %45 = arith.truncf %38 : vector<4x8x8xf32> to vector<4x8x8xbf16>
      "tpu.trace_start"() <{level = 10 : i32, message = "hqk,hkd->hqd"}> : () -> ()
      %cst_30 = arith.constant dense<0.000000e+00> : vector<4x8x8xf32>
      %46 = tpu.matmul %45, %17, %cst_30 {dimension_numbers = #tpu.dot_dimension_numbers<[2], [1], [1], [2], [0, 0, 0, 1, 1, 2], [0], [0]>} : vector<4x8x8xbf16>, vector<4x8x8xbf16>, vector<4x8x8xf32> -> vector<4x8x8xf32>
      "tpu.trace_stop"() : () -> ()
      %c0_31 = arith.constant 0 : index
      %c0_32 = arith.constant 0 : index
      %c0_33 = arith.constant 0 : index
      %47 = vector.load %arg11[%c0_31, %c0_32, %c0_33] : memref<4x8x8xf32, #tpu.memory_space<vmem>>, vector<4x8x8xf32>
      %48 = vector.broadcast %35 : vector<4x8x1xf32> to vector<4x8x8xf32>
      %49 = arith.mulf %48, %47 : vector<4x8x8xf32>
      %50 = arith.addf %49, %46 : vector<4x8x8xf32>
      %c0_34 = arith.constant 0 : index
      %c0_35 = arith.constant 0 : index
      %c0_36 = arith.constant 0 : index
      %51 = vector.load %arg11[%c0_34, %c0_35, %c0_36] : memref<4x8x8xf32, #tpu.memory_space<vmem>>, vector<4x8x8xf32>
      tpu.vector_store %arg11[%c0_34, %c0_35, %c0_36], %50 {strides = array<i32>} : memref<4x8x8xf32, #tpu.memory_space<vmem>>, vector<4x8x8xf32>,
      %c0_37 = arith.constant 0 : index
      %c0_38 = arith.constant 0 : index
      %c0_39 = arith.constant 0 : index
      %52 = vector.load %arg9[%c0_37, %c0_38, %c0_39] : memref<4x8x1xf32, #tpu.memory_space<vmem>>, vector<4x8x1xf32>
      tpu.vector_store %arg9[%c0_37, %c0_38, %c0_39], %33 {strides = array<i32>} : memref<4x8x1xf32, #tpu.memory_space<vmem>>, vector<4x8x1xf32>,
    } else {
    }
    %c0_i32_3 = arith.constant 0 : i32
    %9 = arith.cmpi eq, %arg2, %c0_i32_3 : i32
    %10 = arith.extui %9 : i1 to i32
    %c0_i32_4 = arith.constant 0 : i32
    %11 = arith.cmpi ne, %10, %c0_i32_4 : i32
    scf.if %11 {
      %c0 = arith.constant 0 : index
      %c0_5 = arith.constant 0 : index
      %c0_6 = arith.constant 0 : index
      %12 = vector.load %arg11[%c0, %c0_5, %c0_6] : memref<4x8x8xf32, #tpu.memory_space<vmem>>, vector<4x8x8xf32>
      %c0_7 = arith.constant 0 : index
      %c0_8 = arith.constant 0 : index
      %c0_9 = arith.constant 0 : index
      %13 = vector.load %arg10[%c0_7, %c0_8, %c0_9] : memref<4x8x1xf32, #tpu.memory_space<vmem>>, vector<4x8x1xf32>
      %14 = tpu.reciprocal %13 {approx = true} : vector<4x8x1xf32> -> vector<4x8x1xf32>
      %15 = vector.broadcast %14 : vector<4x8x1xf32> to vector<4x8x8xf32>
      %16 = arith.mulf %12, %15 : vector<4x8x8xf32>
      %17 = arith.truncf %16 : vector<4x8x8xf32> to vector<4x8x8xbf16>
      %c0_10 = arith.constant 0 : index
      %c0_11 = arith.constant 0 : index
      %c0_12 = arith.constant 0 : index
      %18 = vector.load %arg6[%c0_10, %c0_11, %c0_12] : memref<4x8x32xbf16, #tpu.memory_space<vmem>>, vector<4x8x32xbf16>
      "tpu.trace_start"() <{level = 10 : i32, message = "hqd,hdc->hqc"}> : () -> ()
      %cst = arith.constant dense<0.000000e+00> : vector<4x8x32xf32>
      %19 = tpu.matmul %17, %18, %cst {dimension_numbers = #tpu.dot_dimension_numbers<[2], [1], [1], [2], [0, 0, 0, 1, 1, 2], [0], [0]>} : vector<4x8x8xbf16>, vector<4x8x32xbf16>, vector<4x8x32xf32> -> vector<4x8x32xf32>
      "tpu.trace_stop"() : () -> ()
      %cst_13 = arith.constant dense<0.000000e+00> : vector<8x32xf32>
      %20 = vector.multi_reduction <add>, %19, %cst_13 [0] : vector<4x8x32xf32> to vector<8x32xf32>
      %c0_14 = arith.constant 0 : index
      %c0_15 = arith.constant 0 : index
      %21 = vector.load %arg7[%c0_14, %c0_15] : memref<1x32xf32, #tpu.memory_space<vmem>>, vector<1x32xf32>
      %22 = vector.broadcast %21 : vector<1x32xf32> to vector<8x32xf32>
      %23 = arith.addf %20, %22 : vector<8x32xf32>
      %c0_16 = arith.constant 0 : index
      %c0_17 = arith.constant 0 : index
      %c0_18 = arith.constant 0 : index
      %24 = vector.load %arg8[%c0_16, %c0_17, %c0_18] : memref<1x8x32xf32, #tpu.memory_space<vmem>>, vector<1x8x32xf32>
      %25 = vector.shape_cast %24 : vector<1x8x32xf32> to vector<8x32xf32>
      %26 = vector.shape_cast %23 : vector<8x32xf32> to vector<1x8x32xf32>
      tpu.vector_store %arg8[%c0_16, %c0_17, %c0_18], %26 {strides = array<i32>} : memref<1x8x32xf32, #tpu.memory_space<vmem>>, vector<1x8x32xf32>,
    } else {
    }
    return
  }
  func.func @transform_0(%arg0: i32, %arg1: i32, %arg2: i32) -> (i32, i32, i32, i32) {
    %c0_i32 = arith.constant 0 : i32
    %c0_i32_0 = arith.constant 0 : i32
    %c0_i32_1 = arith.constant 0 : i32
    return %arg0, %c0_i32, %arg1, %c0_i32_0 : i32, i32, i32, i32
  }
  func.func @transform_1(%arg0: i32, %arg1: i32, %arg2: i32) -> (i32, i32, i32, i32) {
    %c0_i32 = arith.constant 0 : i32
    %c0_i32_0 = arith.constant 0 : i32
    %c0_i32_1 = arith.constant 0 : i32
    return %arg0, %c0_i32, %arg2, %c0_i32_0 : i32, i32, i32, i32
  }
  func.func @transform_2(%arg0: i32, %arg1: i32, %arg2: i32) -> (i32, i32, i32, i32) {
    %c0_i32 = arith.constant 0 : i32
    %c0_i32_0 = arith.constant 0 : i32
    %c0_i32_1 = arith.constant 0 : i32
    return %arg0, %c0_i32, %arg2, %c0_i32_0 : i32, i32, i32, i32
  }
  func.func @transform_3(%arg0: i32, %arg1: i32, %arg2: i32) -> (i32, i32, i32) {
    %c0_i32 = arith.constant 0 : i32
    %c0_i32_0 = arith.constant 0 : i32
    %c0_i32_1 = arith.constant 0 : i32
    %c0_i32_2 = arith.constant 0 : i32
    return %c0_i32, %c0_i32_0, %c0_i32_1 : i32, i32, i32
  }
  func.func @transform_4(%arg0: i32, %arg1: i32, %arg2: i32) -> (i32, i32) {
    %c0_i32 = arith.constant 0 : i32
    %c0_i32_0 = arith.constant 0 : i32
    %c0_i32_1 = arith.constant 0 : i32
    return %c0_i32, %c0_i32_0 : i32, i32
  }
  func.func @transform_5(%arg0: i32, %arg1: i32, %arg2: i32) -> (i32, i32, i32) {
    %c0_i32 = arith.constant 0 : i32
    %c0_i32_0 = arith.constant 0 : i32
    return %arg0, %arg1, %c0_i32 : i32, i32, i32
  }
}

module attributes {stable_mosaic.version = 11 : i64} {
  func.func @_qkv_proj_kernel(%arg0: i32, %arg1: i32, %arg2: i32, %arg3: memref<1x8x32xf32, #tpu.memory_space<vmem>>, %arg4: memref<1x32x8xbf16, #tpu.memory_space<vmem>>, %arg5: memref<1x32x8xbf16, #tpu.memory_space<vmem>>, %arg6: memref<1x32x8xbf16, #tpu.memory_space<vmem>>, %arg7: memref<1x1x8xf32, #tpu.memory_space<vmem>>, %arg8: memref<1x1x8xf32, #tpu.memory_space<vmem>>, %arg9: memref<1x1x8xf32, #tpu.memory_space<vmem>>, %arg10: memref<1x1x8x8xbf16, #tpu.memory_space<vmem>>, %arg11: memref<1x1x8x8xbf16, #tpu.memory_space<vmem>>, %arg12: memref<1x1x8x8xbf16, #tpu.memory_space<vmem>>) attributes {dimension_semantics = [#tpu.dimension_semantics<parallel>, #tpu.dimension_semantics<parallel>, #tpu.dimension_semantics<parallel>], iteration_bounds = array<i64: 2, 1, 4>, scalar_prefetch = 0 : i64, scratch_operands = 0 : i64, tpu.core_type = #tpu.core_type<tc>, window_params = [{transform_indices = @transform_0, window_bounds = array<i64: 1, 8, 32>}, {transform_indices = @transform_1, window_bounds = array<i64: 1, 32, 8>}, {transform_indices = @transform_2, window_bounds = array<i64: 1, 32, 8>}, {transform_indices = @transform_3, window_bounds = array<i64: 1, 32, 8>}, {transform_indices = @transform_4, window_bounds = array<i64: 1, 1, 8>}, {transform_indices = @transform_5, window_bounds = array<i64: 1, 1, 8>}, {transform_indices = @transform_6, window_bounds = array<i64: 1, 1, 8>}, {transform_indices = @transform_7, window_bounds = array<i64: 1, 1, 8, 8>}, {transform_indices = @transform_8, window_bounds = array<i64: 1, 1, 8, 8>}, {transform_indices = @transform_9, window_bounds = array<i64: 1, 1, 8, 8>}]} {
    %c0 = arith.constant 0 : index
    %c0_0 = arith.constant 0 : index
    %c0_1 = arith.constant 0 : index
    %0 = vector.load %arg3[%c0, %c0_0, %c0_1] : memref<1x8x32xf32, #tpu.memory_space<vmem>>, vector<1x8x32xf32>
    %1 = vector.shape_cast %0 : vector<1x8x32xf32> to vector<8x32xf32>
    %2 = arith.truncf %1 : vector<8x32xf32> to vector<8x32xbf16>
    %c0_2 = arith.constant 0 : index
    %c0_3 = arith.constant 0 : index
    %c0_4 = arith.constant 0 : index
    %3 = vector.load %arg4[%c0_2, %c0_3, %c0_4] : memref<1x32x8xbf16, #tpu.memory_space<vmem>>, vector<1x32x8xbf16>
    %4 = vector.shape_cast %3 : vector<1x32x8xbf16> to vector<32x8xbf16>
    %cst = arith.constant dense<0.000000e+00> : vector<8x8xf32>
    %5 = tpu.matmul %2, %4, %cst {dimension_numbers = #tpu.dot_dimension_numbers<[1], [0], [0], [1], [0, 0, 1, 1], [], []>} : vector<8x32xbf16>, vector<32x8xbf16>, vector<8x8xf32> -> vector<8x8xf32>
    %c0_5 = arith.constant 0 : index
    %c0_6 = arith.constant 0 : index
    %c0_7 = arith.constant 0 : index
    %6 = vector.load %arg7[%c0_5, %c0_6, %c0_7] : memref<1x1x8xf32, #tpu.memory_space<vmem>>, vector<1x1x8xf32>
    %7 = vector.shape_cast %6 : vector<1x1x8xf32> to vector<1x8xf32>
    %8 = vector.broadcast %7 : vector<1x8xf32> to vector<8x8xf32>
    %9 = arith.addf %5, %8 : vector<8x8xf32>
    %c0_8 = arith.constant 0 : index
    %c0_9 = arith.constant 0 : index
    %c0_10 = arith.constant 0 : index
    %10 = vector.load %arg5[%c0_8, %c0_9, %c0_10] : memref<1x32x8xbf16, #tpu.memory_space<vmem>>, vector<1x32x8xbf16>
    %11 = vector.shape_cast %10 : vector<1x32x8xbf16> to vector<32x8xbf16>
    %cst_11 = arith.constant dense<0.000000e+00> : vector<8x8xf32>
    %12 = tpu.matmul %2, %11, %cst_11 {dimension_numbers = #tpu.dot_dimension_numbers<[1], [0], [0], [1], [0, 0, 1, 1], [], []>} : vector<8x32xbf16>, vector<32x8xbf16>, vector<8x8xf32> -> vector<8x8xf32>
    %c0_12 = arith.constant 0 : index
    %c0_13 = arith.constant 0 : index
    %c0_14 = arith.constant 0 : index
    %13 = vector.load %arg8[%c0_12, %c0_13, %c0_14] : memref<1x1x8xf32, #tpu.memory_space<vmem>>, vector<1x1x8xf32>
    %14 = vector.shape_cast %13 : vector<1x1x8xf32> to vector<1x8xf32>
    %15 = vector.broadcast %14 : vector<1x8xf32> to vector<8x8xf32>
    %16 = arith.addf %12, %15 : vector<8x8xf32>
    %c0_15 = arith.constant 0 : index
    %c0_16 = arith.constant 0 : index
    %c0_17 = arith.constant 0 : index
    %17 = vector.load %arg6[%c0_15, %c0_16, %c0_17] : memref<1x32x8xbf16, #tpu.memory_space<vmem>>, vector<1x32x8xbf16>
    %18 = vector.shape_cast %17 : vector<1x32x8xbf16> to vector<32x8xbf16>
    %cst_18 = arith.constant dense<0.000000e+00> : vector<8x8xf32>
    %19 = tpu.matmul %2, %18, %cst_18 {dimension_numbers = #tpu.dot_dimension_numbers<[1], [0], [0], [1], [0, 0, 1, 1], [], []>} : vector<8x32xbf16>, vector<32x8xbf16>, vector<8x8xf32> -> vector<8x8xf32>
    %c0_19 = arith.constant 0 : index
    %c0_20 = arith.constant 0 : index
    %c0_21 = arith.constant 0 : index
    %20 = vector.load %arg9[%c0_19, %c0_20, %c0_21] : memref<1x1x8xf32, #tpu.memory_space<vmem>>, vector<1x1x8xf32>
    %21 = vector.shape_cast %20 : vector<1x1x8xf32> to vector<1x8xf32>
    %22 = vector.broadcast %21 : vector<1x8xf32> to vector<8x8xf32>
    %23 = arith.addf %19, %22 : vector<8x8xf32>
    %24 = arith.truncf %9 : vector<8x8xf32> to vector<8x8xbf16>
    %c0_22 = arith.constant 0 : index
    %c0_23 = arith.constant 0 : index
    %c0_24 = arith.constant 0 : index
    %c0_25 = arith.constant 0 : index
    %25 = vector.load %arg10[%c0_22, %c0_23, %c0_24, %c0_25] : memref<1x1x8x8xbf16, #tpu.memory_space<vmem>>, vector<1x1x8x8xbf16>
    %26 = vector.shape_cast %25 : vector<1x1x8x8xbf16> to vector<8x8xbf16>
    %27 = vector.shape_cast %24 : vector<8x8xbf16> to vector<1x1x8x8xbf16>
    tpu.vector_store %arg10[%c0_22, %c0_23, %c0_24, %c0_25], %27 {strides = array<i32>} : memref<1x1x8x8xbf16, #tpu.memory_space<vmem>>, vector<1x1x8x8xbf16>,
    %28 = arith.truncf %16 : vector<8x8xf32> to vector<8x8xbf16>
    %c0_26 = arith.constant 0 : index
    %c0_27 = arith.constant 0 : index
    %c0_28 = arith.constant 0 : index
    %c0_29 = arith.constant 0 : index
    %29 = vector.load %arg11[%c0_26, %c0_27, %c0_28, %c0_29] : memref<1x1x8x8xbf16, #tpu.memory_space<vmem>>, vector<1x1x8x8xbf16>
    %30 = vector.shape_cast %29 : vector<1x1x8x8xbf16> to vector<8x8xbf16>
    %31 = vector.shape_cast %28 : vector<8x8xbf16> to vector<1x1x8x8xbf16>
    tpu.vector_store %arg11[%c0_26, %c0_27, %c0_28, %c0_29], %31 {strides = array<i32>} : memref<1x1x8x8xbf16, #tpu.memory_space<vmem>>, vector<1x1x8x8xbf16>,
    %32 = arith.truncf %23 : vector<8x8xf32> to vector<8x8xbf16>
    %c0_30 = arith.constant 0 : index
    %c0_31 = arith.constant 0 : index
    %c0_32 = arith.constant 0 : index
    %c0_33 = arith.constant 0 : index
    %33 = vector.load %arg12[%c0_30, %c0_31, %c0_32, %c0_33] : memref<1x1x8x8xbf16, #tpu.memory_space<vmem>>, vector<1x1x8x8xbf16>
    %34 = vector.shape_cast %33 : vector<1x1x8x8xbf16> to vector<8x8xbf16>
    %35 = vector.shape_cast %32 : vector<8x8xbf16> to vector<1x1x8x8xbf16>
    tpu.vector_store %arg12[%c0_30, %c0_31, %c0_32, %c0_33], %35 {strides = array<i32>} : memref<1x1x8x8xbf16, #tpu.memory_space<vmem>>, vector<1x1x8x8xbf16>,
    return
  }
  func.func @transform_0(%arg0: i32, %arg1: i32, %arg2: i32) -> (i32, i32, i32) {
    %c0_i32 = arith.constant 0 : i32
    %c0_i32_0 = arith.constant 0 : i32
    return %arg0, %arg1, %c0_i32 : i32, i32, i32
  }
  func.func @transform_1(%arg0: i32, %arg1: i32, %arg2: i32) -> (i32, i32, i32) {
    %c0_i32 = arith.constant 0 : i32
    %c0_i32_0 = arith.constant 0 : i32
    %c0_i32_1 = arith.constant 0 : i32
    return %arg2, %c0_i32, %c0_i32_0 : i32, i32, i32
  }
  func.func @transform_2(%arg0: i32, %arg1: i32, %arg2: i32) -> (i32, i32, i32) {
    %c0_i32 = arith.constant 0 : i32
    %c0_i32_0 = arith.constant 0 : i32
    %c0_i32_1 = arith.constant 0 : i32
    return %arg2, %c0_i32, %c0_i32_0 : i32, i32, i32
  }
  func.func @transform_3(%arg0: i32, %arg1: i32, %arg2: i32) -> (i32, i32, i32) {
    %c0_i32 = arith.constant 0 : i32
    %c0_i32_0 = arith.constant 0 : i32
    %c0_i32_1 = arith.constant 0 : i32
    return %arg2, %c0_i32, %c0_i32_0 : i32, i32, i32
  }
  func.func @transform_4(%arg0: i32, %arg1: i32, %arg2: i32) -> (i32, i32, i32) {
    %c0_i32 = arith.constant 0 : i32
    %c0_i32_0 = arith.constant 0 : i32
    %c0_i32_1 = arith.constant 0 : i32
    return %arg2, %c0_i32, %c0_i32_0 : i32, i32, i32
  }
  func.func @transform_5(%arg0: i32, %arg1: i32, %arg2: i32) -> (i32, i32, i32) {
    %c0_i32 = arith.constant 0 : i32
    %c0_i32_0 = arith.constant 0 : i32
    %c0_i32_1 = arith.constant 0 : i32
    return %arg2, %c0_i32, %c0_i32_0 : i32, i32, i32
  }
  func.func @transform_6(%arg0: i32, %arg1: i32, %arg2: i32) -> (i32, i32, i32) {
    %c0_i32 = arith.constant 0 : i32
    %c0_i32_0 = arith.constant 0 : i32
    %c0_i32_1 = arith.constant 0 : i32
    return %arg2, %c0_i32, %c0_i32_0 : i32, i32, i32
  }
  func.func @transform_7(%arg0: i32, %arg1: i32, %arg2: i32) -> (i32, i32, i32, i32) {
    %c0_i32 = arith.constant 0 : i32
    %c0_i32_0 = arith.constant 0 : i32
    return %arg0, %arg2, %arg1, %c0_i32 : i32, i32, i32, i32
  }
  func.func @transform_8(%arg0: i32, %arg1: i32, %arg2: i32) -> (i32, i32, i32, i32) {
    %c0_i32 = arith.constant 0 : i32
    %c0_i32_0 = arith.constant 0 : i32
    return %arg0, %arg2, %arg1, %c0_i32 : i32, i32, i32, i32
  }
  func.func @transform_9(%arg0: i32, %arg1: i32, %arg2: i32) -> (i32, i32, i32, i32) {
    %c0_i32 = arith.constant 0 : i32
    %c0_i32_0 = arith.constant 0 : i32
    return %arg0, %arg2, %arg1, %c0_i32 : i32, i32, i32, i32
  }
}

</mosaic_0001>

<bundles_post_ra>
// kernel: causal_self_attention.2
= control target key start
LH: loop header
LB: loop body
LE: loop exit
PB: predicated region body
PF: predicated region fallthrough
CT: control target
= control target key end

     0   :  { %s1219_s30 = smov 0   ;;  %s1221_s10 = smov 0   ;;  %s1311_s0 = inlined_call_operand.vmem [shape: f32[2,8,32], index: 0, kind: input, shape index: {}]   ;;  %s1312_s1 = inlined_call_operand.vmem [shape: bf16[4,32,8], index: 1, kind: input, shape index: {}]   ;;  %s1313_s2 = inlined_call_operand.vmem [shape: bf16[4,32,8], index: 2, kind: input, shape index: {}]   ;;  %s1314_s3 = inlined_call_operand.vmem [shape: bf16[4,32,8], index: 3, kind: input, shape index: {}]   ;;  %s1315_s4 = inlined_call_operand.vmem [shape: f32[4,1,8], index: 4, kind: input, shape index: {}]   ;;  %s1316_s5 = inlined_call_operand.vmem [shape: f32[4,1,8], index: 5, kind: input, shape index: {}]   ;;  %s1317_s6 = inlined_call_operand.vmem [shape: f32[4,1,8], index: 6, kind: input, shape index: {}]   ;;  %s1318_s7 = inlined_call_operand.vmem [shape: bf16[2,4,8,8], index: 7, kind: output, shape index: {0}]   ;;  %s1319_s8 = inlined_call_operand.vmem [shape: bf16[2,4,8,8], index: 8, kind: output, shape index: {1}]   ;;  %s1320_s9 = inlined_call_operand.vmem [shape: bf16[2,4,8,8], index: 9, kind: output, shape index: {2}]  }
   0x1   :  { %s1223_s11 = smov 0   ;;  %s1225_s12 = smov 0  }
   0x2   :  { %s1227_s13 = smov 0  }
   0x3 LB: > { %s32_s14 = sadd.s32 1, %s1157_s11  ;;  %s39_s15 = sadd.s32 1, %s1161_s12  ;;  %s1165_s13 = sphi %s1227_s13, %s20_s13   ;;  %s1161_s12 = sphi %s1225_s12, %s1324_s12   ;;  %s1157_s11 = sphi %s1223_s11, %s1323_s11   ;;  %s1153_s10 = sphi %s1221_s10, %s1322_s10   ;;  %s1149_s30 = sphi %s1219_s30, %s1321_s30  }
   0x4   : > { %p33_p0 = scmp.ge.s32.totalorder %s32_s14, 4  ;;  %p1015_p1 = scmp.ge.s32.totalorder %s1165_s13, 1 }
   0x5   : > { %p381_p2 = scmp.lt.s32.totalorder %s1165_s13, 9 }
   0x6   : > { %s1326_s14 = smov (%p33_p0, %s32_s14), 0  ;;  %s1328_s15 = smov (!%p33_p0, %s39_s15), %s1161_s12 }
   0x7   : > { %p382_p3 = pnand %p1015_p1, %p381_p2  ;;  %p41_p4 = scmp.ge.s32.totalorder %s1328_s15, 2 }
   0x8   : > { %p478_p5 = scmp.lt.s32.totalorder (!%p382_p3), %s1149_s30, 3  ;;  %p471_p6 = scmp.lt.s32.totalorder (!%p382_p3), %s1153_s10, 1 }
   0x9   : > { %s1330_s15 = smov (%p41_p4, %s1328_s15), 0  ;;  %385 = sbr.rel (%p382_p3) target bundleno = 232 (0xe8), region = 48 }
   0xe   : > { %v1167_v0 = vmov 0.0   ;;  %s1332_s30 = smov (!%p478_p5, %s1149_s30), 3  ;;  %vm1168_vm0 = vmmov 0   ;;  %s1334_s10 = smov (!%p471_p6, %s1153_s10), 1  ;;  %vm561_vm1 = vcmask 261120   ;;  %vm732_vm2 = vcmask 60416  }
   0xf   : > { %1055 = vmatprep.subr.bf16.mxu0 %v1167_v0  ;;  %1063 = vmatprep.subr.bf16.mxu1 %v1167_v0  ;;  %s1043_s16 = sshll.u32 %s1332_s30, 4  ;;  %s1016_s23 = sshll.u32 %s1334_s10, 3 }
  0x10   : > { %1059 = vmatprep.mubr.msk.bf16.mxu0 %vm1168_vm0, %v1167_v0  ;;  %1067 = vmatprep.mubr.msk.bf16.mxu1 %vm1168_vm0, %v1167_v0  ;;  %s482_s19 = scalar_lea.vmem %s1312_s1, %s1043_s16  ;;  %s487_s22 = scalar_lea.vmem %s1313_s2, %s1043_s16 }
  0x11   : > { %v1121_v1 = vld [vmem:[%s482_s19 + $0x8] sm:$0xff]   ;;  %s477_s26 = scalar_lea.vmem %s1311_s0, %s1016_s23  ;;  %v1123_v3 = vld [vmem:[%s482_s19] sm:$0xff]   ;;  %s492_s29 = scalar_lea.vmem %s1314_s3, %s1043_s16 }
  0x12   : > { %v1122_v2 = vld [vmem:[%s487_s22 + $0x8] sm:$0xff]   ;;  %1056 = vmatpush3.bf16.msra.mxu0 %v1121_v1  ;;  %v536_v4 = vld [vmem:[%s477_s26] sm:$0xff]  ;;  %s1023_s16 = sshll.u32 %s1334_s10, 2  ;;  %s495_s19 = scalar_lea.vmem %s1315_s4, %s1332_s30 }
  0x13   : > { %1057 = vmatprep.subr.bf16.mxu0 %v1167_v0  ;;  %1064 = vmatpush3.bf16.msra.mxu1 %v1122_v2  ;;  %v1124_v5 = vld [vmem:[%s487_s22] sm:$0xff]   ;;  %v537_v6 = vpack.c.bf16 %v536_v4, %v536_v4  ;;  %v1125_v7 = vld [vmem:[%s492_s29 + $0x8] sm:$0xff]   ;;  %s510_s20 = sadd.s32 %s1023_s16, %s1332_s30  ;;  %s498_s23 = scalar_lea.vmem %s1316_s5, %s1332_s30 }
  0x14   : > { %1065 = vmatprep.subr.bf16.mxu1 %v1167_v0  ;;  %v1126_v8 = vld [vmem:[%s492_s29] sm:$0xff]   ;;  %s1024_s24 = sshll.u32 %s510_s20, 2  ;;  %s501_s18 = scalar_lea.vmem %s1317_s6, %s1332_s30 }
  0x15   : > { %v1029_v9 = vld [vmem:[%s495_s19] ss:$0 sm:$0xff]  ;;  %s512_s10 = scalar_lea.vmem %s1318_s7, %s1024_s24  ;;  %s523_s29 = scalar_lea.vmem %s1319_s8, %s1024_s24 }
  0x16   : > { %1058 = vmatpush3.bf16.msra.mxu0 %v1123_v3  ;;  %v1033_v10 = vld [vmem:[%s498_s23] ss:$0 sm:$0xff]  ;;  %s534_s21 = scalar_lea.vmem %s1320_s9, %s1024_s24 }
  0x17   : > { %1066 = vmatpush3.bf16.msra.mxu1 %v1124_v5  ;;  %1071 = vmatprep.subr.bf16.mxu0 %v1167_v0  ;;  %v1037_v22 = vld [vmem:[%s501_s18] ss:$0 sm:$0xff] }
  0x19   : > { %1060 = vmatmul.mubr.msk.bf16.vlgmr.msra.gmra.mxu0 %vm561_vm1, %v537_v6 }
  0x1a   : > { %1072 = vmatpush3.bf16.msra.mxu0 %v1125_v7  ;;  %1068 = vmatmul.mubr.msk.bf16.vlgmr.msra.gmra.mxu1 %vm561_vm1, %v537_v6 }
  0x1b   : > { %1073 = vmatprep.subr.bf16.mxu0 %v1167_v0  ;;  %1075 = vmatprep.mubr.msk.bf16.mxu0 %vm1168_vm0, %v1167_v0 }
  0x1e   : > { %1074 = vmatpush3.bf16.msra.mxu0 %v1126_v8 }
  0x21   : > { %1076 = vmatmul.mubr.msk.bf16.vlgmr.msra.gmra.mxu0 %vm561_vm1, %v537_v6 }
  0xd9   : > { %v599_v11 = vpop.f32.mrf.mxu0 }
  0xda   : > { %v600_v12 = vadd.f32 %v1029_v9, %v599_v11  ;;  %v662_v13 = vpop.f32.mrf.mxu1 }
  0xdb   : > { %v1061_v14 = vpop.f32.mrf.mxu0  ;;  %v663_v15 = vadd.f32 %v1033_v10, %v662_v13 }
  0xdc   : > { %v731_v16 = vpack.c.bf16 %v600_v12, %v600_v12  ;;  %v1069_v17 = vpop.f32.mrf.mxu1 }
  0xdd   : > { %v734_v18 = vpack.c.bf16 %v663_v15, %v663_v15  ;;  %v602_v19 = vpop.f32.mrf.mxu0 }
  0xde   : > { %733 = vst.msk [vmem:[%s512_s10] sm:$0xf] %vm732_vm2, %v731_v16  ;;  %v665_v20 = vpop.f32.mrf.mxu1 }
  0xdf   : > { %735 = vst.msk [vmem:[%s523_s29] sm:$0xf] %vm732_vm2, %v734_v18  ;;  %v1062_v21 = vpop.f32.mrf.mxu0 }
  0xe0   : > { %v1070_v23 = vpop.f32.mrf.mxu1 }
  0xe1   : > { %v725_v24 = vpop.f32.mrf.mxu0 }
  0xe2   : > { %v726_v25 = vadd.f32 %v1037_v22, %v725_v24 }
  0xe3   : > { %v1077_v26 = vpop.f32.mrf.mxu0 }
  0xe4   : > { %v736_v27 = vpack.c.bf16 %v726_v25, %v726_v25 }
  0xe5   : > { %v728_v28 = vpop.f32.mrf.mxu0 }
  0xe6   : > { %737 = vst.msk [vmem:[%s534_s21] sm:$0xf] %vm732_vm2, %v736_v27 }
  0xe7   : > { %v1078_v29 = vpop.f32.mrf.mxu0 }
  0xe8 PF: > { %s20_s13 = sadd.s32 1, %s1165_s13   ;;  %s1321_s30 = smov %s1157_s11 }
  0xe9   : > { %p17_p7 = scmp.ge.s32.totalorder %s20_s13, 10   ;;  %s1322_s10 = smov %s1161_s12 }
  0xea   : > { %s1323_s11 = smov %s1326_s14  ;;  %s1324_s12 = smov %s1330_s15 }
  0xeb   :  { %19 = sbr.rel (!%p17_p7) target bundleno = 3 (0x3), region = 120 }

// kernel: causal_self_attention.3
= control target key start
LH: loop header
LB: loop body
LE: loop exit
PB: predicated region body
PF: predicated region fallthrough
CT: control target
= control target key end

     0   :  { %10 = vsyncpa [#allocation6], 0  ;;  %s1882_s0 = inlined_call_operand.vmem [shape: bf16[2,4,8,8], index: 0, kind: input, shape index: {}]   ;;  %s1883_s1 = inlined_call_operand.vmem [shape: bf16[2,4,8,8], index: 1, kind: input, shape index: {}]   ;;  %s1884_s2 = inlined_call_operand.vmem [shape: bf16[2,4,8,8], index: 2, kind: input, shape index: {}]   ;;  %s1885_s3 = inlined_call_operand.vmem [shape: bf16[4,8,32], index: 3, kind: input, shape index: {}]   ;;  %s1886_s4 = inlined_call_operand.vmem [shape: f32[1,32], index: 4, kind: input, shape index: {}]   ;;  %s1887_s5 = inlined_call_operand.hbm [shape: f32[2,8,32], index: 5, kind: output, shape index: {}]  }
   0x1   :  { %12 = vsyncpa [#allocation6 + $0x1], 0  ;;  %s1579_s18 = smov 0   ;;  %s1581_s19 = smov 0  }
   0x2   :  { %s1583_s20 = smov 0   ;;  %s1585_s21 = smov 0  }
   0x3   :  { %s1587_s22 = smov 0   ;;  %s1589_s23 = smov 0  }
   0x4 LB: > { %s1253_s24 = sadd.s32 4294967295, %s1542_s23   ;;  %s1254_s25 = sadd.s32 4294967294, %s1542_s23   ;;  %s1542_s23 = sphi %s1589_s23, %s18_s23   ;;  %s1538_s22 = sphi %s1587_s22, %s1894_s22   ;;  %s1534_s21 = sphi %s1585_s21, %s1893_s21   ;;  %s1530_s20 = sphi %s1583_s20, %s1892_s20   ;;  %s1526_s19 = sphi %s1581_s19, %s1891_s19   ;;  %s1522_s18 = sphi %s1579_s18, %s1890_s18  }
   0x5   : > { %s37_s26 = sadd.s32 1, %s1538_s22  ;;  %s172_s27 = sadd.s32 1, %s1530_s20 }
   0x6   : > { %p39_p0 = scmp.ge.s32.totalorder %s37_s26, 2  ;;  %p182_p1 = scmp.ne.s32.totalorder %s1530_s20, %s1526_s19 }
   0x7   : > { %p183_p2 = scmp.eq.s32.totalorder %s1253_s24, 1  ;;  %p188_p3 = scmp.ne.s32.totalorder %s1526_s19, %s1522_s18 }
   0x8   : > { %s1896_s26 = smov (%p39_p0, %s37_s26), 0  ;;  %p189_p5 = scmp.eq.s32.totalorder %s1254_s25, 1 }
   0x9   : > { %p1619_p4 = por %p183_p2, %p182_p1  ;;  %s167_s29 = ssub.s32 %s1538_s22, %s1896_s26 }
   0xa   : > { %p1257_p6 = scmp.ge.s32.totalorder %s1542_s23, 1  ;;  %p170_p7 = scmp.eq.s32.totalorder %s167_s29, 0 }
   0xb   : > { %p1626_p8 = por %p189_p5, %p188_p3  ;;  %p246_p9 = scmp.lt.s32.totalorder %s1542_s23, 3 }
   0xc   : > { %s1632_s6 = scalar_select %p170_p7, %s1530_s20, %s172_s27  }
   0xd   : > { %p247_p10 = pnand %p1257_p6, %p246_p9 }
   0xe   : > { %p293_p11 = scmp.lt.s32.totalorder (!%p247_p10), %s1534_s21, 1  ;;  %s1279_s15 = sshll.u32 (!%p247_p10), %s1534_s21, 7 }
   0xf   : > { %250 = sbr.rel (%p247_p10) target bundleno = 1024 (0x400), region = 40  ;;  %s1839_s27 = scalar_lea.hbm (!%p247_p10), %s1887_s5, %s1279_s15 }
  0x14   : > { %vm331_vm0 = vcmask 64512   ;;  %v1544_v0 = vmov 0.0   ;;  %s294_s7 = scalar_select %p293_p11, %s1534_s21, 1  ;;  %vm1545_vm1 = vmmov 0   ;;  %vm322_vm2 = vcmask 7168  }
  0x15   : > { %1309 = vmatprep.subr.bf16.mxu0 %v1544_v0  ;;  %1315 = vmatprep.subr.bf16.mxu1 %v1544_v0  ;;  %332 = vst.msk [vmem:[#allocation4] sm:$0xff] %vm331_vm0, %v1544_v0  ;;  %333 = vst.msk [vmem:[#allocation4 + $0x8] sm:$0xff] %vm331_vm0, %v1544_v0  ;;  %v1546_v13 = vmov -1e+30   ;;  %v540_v14 = vlaneseq  ;;  %v1547_v41 = vmov 0   ;;  %vm653_vm4 = vcmask 1043456  }
  0x16   : > { %334 = vst.msk [vmem:[#allocation4 + $0x10] sm:$0xff] %vm331_vm0, %v1544_v0  ;;  %335 = vst.msk [vmem:[#allocation4 + $0x18] sm:$0xff] %vm331_vm0, %v1544_v0  ;;  %1311 = vmatprep.mubr.msk.bf16.mxu0 %vm1545_vm1, %v1544_v0  ;;  %1317 = vmatprep.mubr.msk.bf16.mxu1 %vm1545_vm1, %v1544_v0  ;;  %s1650_s8 = sshll.u32 %s294_s7, 4  ;;  %vm1108_vm5 = vcmask 261120   ;;  %s1548_s21 = smov [#allocation5]  }
  0x17   : > { %s308_s11 = scalar_lea.vmem %s1883_s1, %s1650_s8  ;;  %s300_s14 = scalar_lea.vmem %s1882_s0, %s1650_s8  ;;  %323 = vst.msk [vmem:[#allocation2] sm:$0xff] %vm322_vm2, %v1546_v13  ;;  %324 = vst.msk [vmem:[#allocation2 + $0x8] sm:$0xff] %vm322_vm2, %v1546_v13  ;;  %v541_v15 = vshrl.u32 %v540_v14, 7  ;;  %v545_v16 = vand.u32 127, %v540_v14  ;;  %1440 = vset.pattern.permute.xlu0 %v1547_v41  ;;  %1441 = vset.pattern.permute.xlu1 %v1547_v41 }
  0x18   : > { %v347_v1 = vld [vmem:[%s308_s11] sm:$0xf]  ;;  %v348_v2 = vld [vmem:[%s308_s11 + $0x4] sm:$0xf]  ;;  %v349_v5 = vld [vmem:[%s308_s11 + $0x8] sm:$0xf]  ;;  %s1745_s17 = scalar_lea.vmem %s1884_s2, %s1650_s8 }
  0x19   : > { %v360_v3 = vsel %vm331_vm0, %v347_v1, 0  ;;  %v406_v4 = vsel %vm331_vm0, %v348_v2, 0  ;;  %v350_v6 = vld [vmem:[%s308_s11 + $0xc] sm:$0xf]  ;;  %v343_v7 = vld [vmem:[%s300_s14] sm:$0xf]  ;;  %vm548_vm3 = vcmp.ge.s32.totalorder %v541_v15, %v545_v16 }
  0x1a   : > { %1310 = vmatpush3.bf16.xpose.msra.mxu0 %v360_v3  ;;  %1316 = vmatpush3.bf16.xpose.msra.mxu1 %v406_v4  ;;  %v344_v8 = vld [vmem:[%s300_s14 + $0x4] sm:$0xf]  ;;  %v452_v9 = vsel %vm331_vm0, %v349_v5, 0  ;;  %v498_v10 = vsel %vm331_vm0, %v350_v6, 0  ;;  %v345_v11 = vld [vmem:[%s300_s14 + $0x8] sm:$0xf] }
  0x1b   : > { %1321 = vmatprep.subr.bf16.mxu0 %v1544_v0  ;;  %1327 = vmatprep.subr.bf16.mxu1 %v1544_v0  ;;  %v346_v12 = vld [vmem:[%s300_s14 + $0xc] sm:$0xf]  ;;  %325 = vst.msk [vmem:[#allocation2 + $0x10] sm:$0xff] %vm322_vm2, %v1546_v13  ;;  %326 = vst.msk [vmem:[#allocation2 + $0x18] sm:$0xff] %vm322_vm2, %v1546_v13  ;;  %v351_v57 = vld [vmem:[%s1745_s17] sm:$0xf] }
  0x1c   : > { %327 = vst.msk [vmem:[#allocation3] sm:$0xff] %vm322_vm2, %v1544_v0  ;;  %328 = vst.msk [vmem:[#allocation3 + $0x8] sm:$0xff] %vm322_vm2, %v1544_v0  ;;  %v655_v59 = vsel %vm653_vm4, %v351_v57, 0  ;;  %v352_v60 = vld [vmem:[%s1745_s17 + $0x4] sm:$0xf]  ;;  %s290_s11 = sand.u32 1, %s1526_s19  }
  0x1d   : > { %329 = vst.msk [vmem:[#allocation3 + $0x10] sm:$0xff] %vm322_vm2, %v1544_v0  ;;  %330 = vst.msk [vmem:[#allocation3 + $0x18] sm:$0xff] %vm322_vm2, %v1544_v0  ;;  %v701_v61 = vsel %vm653_vm4, %v352_v60, 0  ;;  %v354_v16 = vld [vmem:[%s1745_s17 + $0xc] sm:$0xf]  ;;  %s1258_s12 = sshll.u32 %s290_s11, 3 }
  0x1e   : > { %v1706_v42 = vld [vmem:[#allocation2] sm:$0xff]  ;;  %v1711_v45 = vld [vmem:[#allocation2 + $0x8] sm:$0xff]  ;;  %s292_s16 = scalar_lea.vmem [#allocation5], %s1258_s12  ;;  %s1126_s29 = scalar_lea.sflag [#allocation6], %s290_s11 }
  0x1f   : > { %v919_v57 = vld [vmem:[%s1885_s3 + $0x4] sm:$0xf]  ;;  %s1470_s8 = sshll.u32 %s1548_s21, 4  ;;  %s1471_s8 = int_to_ptr.vmem [resolvable:$false] %s1470_s8 }
  0x20   : > { %s1472_s9 = scalar_lea.vmem %s1471_s8, 256 }
  0x21   : > { %1312 = vmatmul.mubr.msk.bf16.vlgmr.msra.gmra.mxu0 %vm331_vm0, %v343_v7  ;;  %1318 = vmatmul.mubr.msk.bf16.vlgmr.msra.gmra.mxu1 %vm331_vm0, %v344_v8 }
  0x22   : > { %1322 = vmatpush3.bf16.xpose.msra.mxu0 %v452_v9  ;;  %1328 = vmatpush3.bf16.xpose.msra.mxu1 %v498_v10  ;;  %v1721_v49 = vld [vmem:[#allocation2 + $0x10] sm:$0xff]  ;;  %v1731_v53 = vld [vmem:[#allocation2 + $0x18] sm:$0xff] }
  0x23   : > { %1323 = vmatprep.mubr.msk.bf16.mxu0 %vm1545_vm1, %v1544_v0  ;;  %1329 = vmatprep.mubr.msk.bf16.mxu1 %vm1545_vm1, %v1544_v0 }
  0x24   : > { %1333 = vmatprep.subr.bf16.mxu0 %v1544_v0  ;;  %1339 = vmatprep.subr.bf16.mxu1 %v1544_v0 }
  0x29   : > { %1324 = vmatmul.mubr.msk.bf16.vlgmr.msra.gmra.mxu0 %vm331_vm0, %v345_v11  ;;  %1330 = vmatmul.mubr.msk.bf16.vlgmr.msra.gmra.mxu1 %vm331_vm0, %v346_v12  ;;  %v353_v11 = vld [vmem:[%s1745_s17 + $0x8] sm:$0xf]  ;;  %s1140_s17 = sshll.u32 %s292_s16, 4  ;;  %s1141_s17 = int_to_ptr.vmem [resolvable:$true] %s1140_s17 }
  0x2a   : > { %1335 = vmatprep.mubr.msk.bf16.mxu0 %vm1545_vm1, %v1544_v0  ;;  %1341 = vmatprep.mubr.msk.bf16.mxu1 %vm1545_vm1, %v1544_v0  ;;  %v747_v15 = vsel %vm653_vm4, %v353_v11, 0  ;;  %s1466_s7 = scalar_lea.vmem %s1141_s17, 128  ;;  %p1473_p1 = scmp.lt.s32.totalorder %s1141_s17, %s1471_s8 }
  0x2b   : > { %1334 = vmatpush3.bf16.msra.mxu0 %v655_v59  ;;  %1340 = vmatpush3.bf16.msra.mxu1 %v701_v61  ;;  %v974_v59 = vsel %vm653_vm4, %v919_v57, 0  ;;  %p1467_p12 = scmp.ne.s32.totalorder %s1141_s17, %s1466_s7  ;;  %p1474_p2 = scmp.lt.s32.totalorder %s1472_s9, %s1466_s7 }
  0x2c   : > { %1345 = vmatprep.subr.bf16.mxu0 %v1544_v0  ;;  %1351 = vmatprep.subr.bf16.mxu1 %v1544_v0 }
  0x2d   : > { %p1468_p13 = pnand %p1467_p12, %p1619_p4  ;;  %p1475_p3 = por %p1474_p2, %p1473_p1 }
  0x2f   : > { %p1469_p0 = pneg %p1468_p13 }
  0x31   : > { %p1476_p5 = pnand %p1475_p3, %p1469_p0 }
  0xe1   : > { %v396_v17 = vpop.f32.mrf.mxu0  ;;  %v442_v18 = vpop.f32.mrf.mxu1 }
  0xe2   : > { %v1693_v19 = vsel %vm548_vm3, %v396_v17, -1e+30  ;;  %v1696_v20 = vsel %vm548_vm3, %v442_v18, -1e+30 }
  0xe3   : > { %v1313_v21 = vpop.f32.mrf.mxu0  ;;  %v1319_v22 = vpop.f32.mrf.mxu1  ;;  %v557_v23 = vsel %vm331_vm0, %v1693_v19, -inf  ;;  %v560_v26 = vsel %vm331_vm0, %v1696_v20, -inf }
  0xe4   : > { %558 = vmax.xlane.f32.xlu0 %v557_v23 }
  0xe5   : > { %v399_v24 = vpop.f32.mrf.mxu0  ;;  %v445_v25 = vpop.f32.mrf.mxu1 }
  0xe7   : > { %v1314_v27 = vpop.f32.mrf.mxu0  ;;  %v1320_v28 = vpop.f32.mrf.mxu1 }
  0xe8   : > { %561 = vmax.xlane.f32.xlu0 %v560_v26 }
  0xe9   : > { %v488_v29 = vpop.f32.mrf.mxu0  ;;  %v534_v30 = vpop.f32.mrf.mxu1 }
  0xea   : > { %v551_v31 = vsel %vm548_vm3, %v488_v29, -1e+30  ;;  %v552_v32 = vsel %vm548_vm3, %v534_v30, -1e+30 }
  0xeb   : > { %v1325_v33 = vpop.f32.mrf.mxu0  ;;  %v1331_v34 = vpop.f32.mrf.mxu1  ;;  %v563_v35 = vsel %vm331_vm0, %v551_v31, -inf  ;;  %v566_v38 = vsel %vm331_vm0, %v552_v32, -inf }
  0xec   : > { %564 = vmax.xlane.f32.xlu1 %v563_v35  ;;  %v918_v35 = vld [vmem:[%s1885_s3] sm:$0xf] }
  0xed   : > { %v491_v36 = vpop.f32.mrf.mxu0  ;;  %v537_v37 = vpop.f32.mrf.mxu1 }
  0xee   : > { %v928_v36 = vsel %vm653_vm4, %v918_v35, 0  ;;  %v617_v37 = vld [vmem:[#allocation3] sm:$0xff] }
  0xef   : > { %v1326_v39 = vpop.f32.mrf.mxu0  ;;  %v1332_v40 = vpop.f32.mrf.mxu1 }
  0xf0   : > { %567 = vmax.xlane.f32.xlu1 %v566_v38  ;;  %v618_v40 = vld [vmem:[#allocation3 + $0x8] sm:$0xff] }
 0x16d   : > { %v559_v43 = vpop.xlane.xlu0 %558 }
 0x16e   : > { %v1709_v44 = vmax.f32 %v1706_v42, %v559_v43 }
 0x170   : > { %v573_v46 = vsub.f32 %v1706_v42, %v1709_v44  ;;  %871 = vst.msk [vmem:[#allocation2] sm:$0xff] %vm322_vm2, %v1709_v44  ;;  %587 = vperm.xlu0 %1440, %v1709_v44   ;;  %v619_v44 = vld [vmem:[#allocation3 + $0x10] sm:$0xff] }
 0x171   : > { %v562_v47 = vpop.xlane.xlu0 %561 }
 0x172   : > { %v1719_v48 = vmax.f32 %v1711_v45, %v562_v47  ;;  %v577_v26 = vmul.f32 1.442695, %v573_v46 }
 0x174   : > { %v574_v50 = vsub.f32 %v1711_v45, %v1719_v48  ;;  %872 = vst.msk [vmem:[#allocation2 + $0x8] sm:$0xff] %vm322_vm2, %v1719_v48  ;;  %592 = vperm.xlu1 %1441, %v1719_v48   ;;  %v620_v48 = vld [vmem:[#allocation3 + $0x18] sm:$0xff] }
 0x175   : > { %v565_v51 = vpop.xlane.xlu1 %564 }
 0x176   : > { %v1729_v52 = vmax.f32 %v1721_v49, %v565_v51  ;;  %v579_v24 = vmul.f32 1.442695, %v574_v50 }
 0x178   : > { %v575_v54 = vsub.f32 %v1721_v49, %v1729_v52  ;;  %873 = vst.msk [vmem:[#allocation2 + $0x10] sm:$0xff] %vm322_vm2, %v1729_v52  ;;  %597 = vperm.xlu1 %1441, %v1729_v52  }
 0x179   : > { %v568_v55 = vpop.xlane.xlu1 %567 }
 0x17a   : > { %v1739_v56 = vmax.f32 %v1731_v53, %v568_v55  ;;  %v581_v29 = vmul.f32 1.442695, %v575_v54 }
 0x17c   : > { %v576_v58 = vsub.f32 %v1731_v53, %v1739_v56  ;;  %874 = vst.msk [vmem:[#allocation2 + $0x18] sm:$0xff] %vm322_vm2, %v1739_v56  ;;  %602 = vperm.xlu1 %1441, %v1739_v56  }
 0x17e   : > { %v583_v30 = vmul.f32 1.442695, %v576_v58 }
 0x1eb   : > { %v588_v62 = vpop.permute.xlu0 %587 }
 0x1ec   : > { %v605_v63 = vsub.f32 %v1693_v19, %v588_v62 }
 0x1ee   : > { %v609_v1 = vmul.f32 1.442695, %v605_v63 }
 0x1ef   : > { %v593_v2 = vpop.permute.xlu1 %592 }
 0x1f0   : > { %1442 = vpow2.f32 %v609_v1  ;;  %v606_v3 = vsub.f32 %v1696_v20, %v593_v2  ;;  %v793_v20 = vsel %vm653_vm4, %v354_v16, 0  ;;  %v835_v1 = vld [vmem:[#allocation4] sm:$0xff] }
 0x1f2   : > { %v611_v4 = vmul.f32 1.442695, %v606_v3  ;;  %v836_v3 = vld [vmem:[#allocation4 + $0x8] sm:$0xff] }
 0x1f3   : > { %v598_v5 = vpop.permute.xlu1 %597 }
 0x1f4   : > { %1444 = vpow2.f32 %v611_v4  ;;  %v607_v6 = vsub.f32 %v551_v31, %v598_v5 }
 0x1f6   : > { %v613_v7 = vmul.f32 1.442695, %v607_v6 }
 0x1f7   : > { %v603_v8 = vpop.permute.xlu1 %602 }
 0x1f8   : > { %1446 = vpow2.f32 %v613_v7  ;;  %v608_v9 = vsub.f32 %v552_v32, %v603_v8 }
 0x1fa   : > { %v615_v10 = vmul.f32 1.442695, %v608_v9 }
 0x1fc   : > { %1448 = vpow2.f32 %v615_v10  ;;  %v837_v10 = vld [vmem:[#allocation4 + $0x10] sm:$0xff] }
 0x1fd   : > { %v1443_v12 = vpop.eup %1442  ;;  %1450 = vpow2.f32 %v579_v24 }
 0x1fe   : > { %v625_v13 = vsel %vm331_vm0, %v1443_v12, 0.0  ;;  %v646_v14 = vpack.c.bf16 %v1443_v12, %v1443_v12  ;;  %1452 = vpow2.f32 %v577_v26 }
 0x1ff   : > { %626 = vadd.xlane.f32.xlu1 %v625_v13  ;;  %1454 = vpow2.f32 %v581_v29 }
 0x200   : > { %1336 = vmatmul.mubr.msk.bf16.vlgmr.msra.gmra.mxu0 %vm331_vm0, %v646_v14  ;;  %1456 = vpow2.f32 %v583_v30 }
 0x201   : > { %v1445_v17 = vpop.eup %1444  ;;  %1346 = vmatpush3.bf16.msra.mxu0 %v747_v15  ;;  %1347 = vmatprep.mubr.msk.bf16.mxu0 %vm1545_vm1, %v1544_v0 }
 0x202   : > { %v628_v18 = vsel %vm331_vm0, %v1445_v17, 0.0  ;;  %v647_v19 = vpack.c.bf16 %v1445_v17, %v1445_v17  ;;  %1357 = vmatprep.subr.bf16.mxu0 %v1544_v0 }
 0x203   : > { %629 = vadd.xlane.f32.xlu0 %v628_v18  ;;  %v838_v18 = vld [vmem:[#allocation4 + $0x18] sm:$0xff] }
 0x204   : > { %1342 = vmatmul.mubr.msk.bf16.vlgmr.msra.gmra.mxu1 %vm331_vm0, %v647_v19 }
 0x205   : > { %v1447_v21 = vpop.eup %1446  ;;  %1352 = vmatpush3.bf16.msra.mxu1 %v793_v20  ;;  %1353 = vmatprep.mubr.msk.bf16.mxu1 %vm1545_vm1, %v1544_v0 }
 0x206   : > { %v631_v22 = vsel %vm331_vm0, %v1447_v21, 0.0  ;;  %v648_v23 = vpack.c.bf16 %v1447_v21, %v1447_v21  ;;  %1363 = vmatprep.subr.bf16.mxu1 %v1544_v0 }
 0x207   : > { %632 = vadd.xlane.f32.xlu1 %v631_v22 }
 0x208   : > { %1348 = vmatmul.mubr.msk.bf16.vlgmr.msra.gmra.mxu0 %vm331_vm0, %v648_v23 }
 0x209   : > { %v1449_v25 = vpop.eup %1448  ;;  %1359 = vmatprep.mubr.msk.bf16.mxu0 %vm1545_vm1, %v1544_v0  ;;  %1358 = vmatpush3.bf16.msra.mxu0 %v928_v36 }
 0x20a   : > { %v634_v27 = vsel %vm331_vm0, %v1449_v25, 0.0  ;;  %v649_v28 = vpack.c.bf16 %v1449_v25, %v1449_v25  ;;  %v1451_v31 = vpop.eup %1450  ;;  %1369 = vmatprep.subr.bf16.mxu0 %v1544_v0 }
 0x20b   : > { %635 = vadd.xlane.f32.xlu1 %v634_v27  ;;  %v1453_v32 = vpop.eup %1452  ;;  %v622_v42 = vmul.f32 %v1451_v31, %v618_v40  ;;  %v921_v40 = vld [vmem:[%s1885_s3 + $0xc] sm:$0xf] }
 0x20c   : > { %1354 = vmatmul.mubr.msk.bf16.vlgmr.msra.gmra.mxu1 %vm331_vm0, %v649_v28  ;;  %v1455_v33 = vpop.eup %1454  ;;  %v621_v38 = vmul.f32 %v1453_v32, %v617_v37 }
 0x20d   : > { %1365 = vmatprep.mubr.msk.bf16.mxu1 %vm1545_vm1, %v1544_v0  ;;  %v1457_v34 = vpop.eup %1456  ;;  %v623_v46 = vmul.f32 %v1455_v33, %v619_v44  ;;  %1364 = vmatpush3.bf16.msra.mxu1 %v974_v59 }
 0x20e   : > { %v624_v51 = vmul.f32 %v1457_v34, %v620_v48  ;;  %1375 = vmatprep.subr.bf16.mxu1 %v1544_v0 }
 0x219   : > { %846 = vperm.xlu0 %1440, %v1451_v31  }
 0x21c   : > { %841 = vperm.xlu1 %1441, %v1453_v32  }
 0x220   : > { %851 = vperm.xlu1 %1441, %v1455_v33  }
 0x224   : > { %856 = vperm.xlu1 %1441, %v1457_v34   ;;  %v920_v34 = vld [vmem:[%s1885_s3 + $0x8] sm:$0xf] }
 0x225   : > { %v1020_v37 = vsel %vm653_vm4, %v920_v34, 0 }
 0x288   : > { %v627_v39 = vpop.xlane.xlu1 %626 }
 0x289   : > { %v637_v41 = vadd.f32 %v627_v39, %v621_v38 }
 0x28b   : > { %642 = vst.msk [vmem:[#allocation3] sm:$0xff] %vm322_vm2, %v637_v41 }
 0x28c   : > { %v630_v43 = vpop.xlane.xlu0 %629 }
 0x28d   : > { %v638_v45 = vadd.f32 %v630_v43, %v622_v42  ;;  %v1066_v43 = vsel %vm653_vm4, %v921_v40, 0 }
 0x28f   : > { %643 = vst.msk [vmem:[#allocation3 + $0x8] sm:$0xff] %vm322_vm2, %v638_v45 }
 0x290   : > { %v633_v47 = vpop.xlane.xlu1 %632 }
 0x291   : > { %v639_v49 = vadd.f32 %v633_v47, %v623_v46 }
 0x292   : > { %v882_v50 = vld [vmem:[#allocation3] sm:$0xff] }
 0x293   : > { %644 = vst.msk [vmem:[#allocation3 + $0x10] sm:$0xff] %vm322_vm2, %v639_v49  ;;  %1458 = vrcp.f32 %v882_v50 }
 0x294   : > { %v636_v52 = vpop.xlane.xlu1 %635  ;;  %v847_v4 = vpop.permute.xlu0 %846 }
 0x295   : > { %v640_v53 = vadd.f32 %v636_v52, %v624_v51  ;;  %v860_v9 = vmul.f32 %v847_v4, %v836_v3 }
 0x296   : > { %v883_v54 = vld [vmem:[#allocation3 + $0x8] sm:$0xff] }
 0x297   : > { %645 = vst.msk [vmem:[#allocation3 + $0x18] sm:$0xff] %vm322_vm2, %v640_v53  ;;  %1460 = vrcp.f32 %v883_v54 }
 0x298   : > { %v842_v63 = vpop.permute.xlu1 %841 }
 0x299   : > { %v859_v2 = vmul.f32 %v842_v63, %v835_v1 }
 0x29a   : > { %v884_v55 = vld [vmem:[#allocation3 + $0x10] sm:$0xff] }
 0x29b   : > { %1462 = vrcp.f32 %v884_v55 }
 0x29c   : > { %v852_v6 = vpop.permute.xlu1 %851 }
 0x29d   : > { %v861_v16 = vmul.f32 %v852_v6, %v837_v10  ;;  %v1277_v6 = vld [vmem:[%s1886_s4] ss:$0 sm:$0xff] }
 0x29e   : > { %v885_v56 = vld [vmem:[#allocation3 + $0x18] sm:$0xff] }
 0x29f   : > { %1464 = vrcp.f32 %v885_v56 }
 0x2a0   : > { %v1459_v58 = vpop.eup %1458  ;;  %v857_v17 = vpop.permute.xlu1 %856 }
 0x2a1   : > { %892 = vperm.xlu1 %1441, %v1459_v58   ;;  %v862_v24 = vmul.f32 %v857_v17, %v838_v18 }
 0x2a4   : > { %v1461_v60 = vpop.eup %1460 }
 0x2a5   : > { %897 = vperm.xlu0 %1440, %v1461_v60  }
 0x2a8   : > { %v1463_v61 = vpop.eup %1462 }
 0x2a9   : > { %902 = vperm.xlu1 %1441, %v1463_v61  }
 0x2ac   : > { %v1465_v62 = vpop.eup %1464 }
 0x2ad   : > { %907 = vperm.xlu0 %1440, %v1465_v62  }
 0x2c0   : > { %v691_v5 = vpop.f32.mrf.mxu0 }
 0x2c1   : > { %v863_v7 = vadd.f32 %v859_v2, %v691_v5 }
 0x2c2   : > { %v1337_v8 = vpop.f32.mrf.mxu0 }
 0x2c3   : > { %867 = vst.msk [vmem:[#allocation4] sm:$0xff] %vm331_vm0, %v863_v7 }
 0x2c4   : > { %v694_v11 = vpop.f32.mrf.mxu0  ;;  %v737_v12 = vpop.f32.mrf.mxu1 }
 0x2c5   : > { %v864_v13 = vadd.f32 %v860_v9, %v737_v12 }
 0x2c6   : > { %v1338_v14 = vpop.f32.mrf.mxu0  ;;  %v1343_v15 = vpop.f32.mrf.mxu1 }
 0x2c7   : > { %868 = vst.msk [vmem:[#allocation4 + $0x8] sm:$0xff] %vm331_vm0, %v864_v13 }
 0x2c8   : > { %v740_v19 = vpop.f32.mrf.mxu1  ;;  %v783_v20 = vpop.f32.mrf.mxu0 }
 0x2c9   : > { %v865_v21 = vadd.f32 %v861_v16, %v783_v20 }
 0x2ca   : > { %v1344_v22 = vpop.f32.mrf.mxu1  ;;  %v1349_v23 = vpop.f32.mrf.mxu0  ;;  %v878_v33 = vld [vmem:[#allocation4] sm:$0xff] }
 0x2cb   : > { %869 = vst.msk [vmem:[#allocation4 + $0x10] sm:$0xff] %vm331_vm0, %v865_v21 }
 0x2cc   : > { %v786_v25 = vpop.f32.mrf.mxu0  ;;  %v829_v26 = vpop.f32.mrf.mxu1 }
 0x2cd   : > { %v866_v27 = vadd.f32 %v862_v24, %v829_v26 }
 0x2ce   : > { %v1350_v28 = vpop.f32.mrf.mxu0  ;;  %v1355_v29 = vpop.f32.mrf.mxu1  ;;  %v879_v38 = vld [vmem:[#allocation4 + $0x8] sm:$0xff] }
 0x2cf   : > { %870 = vst.msk [vmem:[#allocation4 + $0x18] sm:$0xff] %vm331_vm0, %v866_v27 }
 0x2d0   : > { %v832_v30 = vpop.f32.mrf.mxu1 }
 0x2d2   : > { %v1356_v31 = vpop.f32.mrf.mxu1  ;;  %v880_v45 = vld [vmem:[#allocation4 + $0x10] sm:$0xff] }
 0x2d6   : > { %v881_v49 = vld [vmem:[#allocation4 + $0x18] sm:$0xff] }
 0x31c   : > { %v893_v32 = vpop.permute.xlu1 %892 }
 0x31d   : > { %v910_v35 = vmul.f32 %v893_v32, %v878_v33 }
 0x31f   : > { %v914_v36 = vpack.c.bf16 %v910_v35, %v910_v35 }
 0x320   : > { %v898_v39 = vpop.permute.xlu0 %897 }
 0x321   : > { %v911_v41 = vmul.f32 %v898_v39, %v879_v38  ;;  %1360 = vmatmul.mubr.msk.bf16.vlgmr.msra.gmra.mxu0 %vm331_vm0, %v914_v36 }
 0x322   : > { %1370 = vmatpush3.bf16.msra.mxu0 %v1020_v37  ;;  %1371 = vmatprep.mubr.msk.bf16.mxu0 %vm1545_vm1, %v1544_v0 }
 0x323   : > { %v915_v42 = vpack.c.bf16 %v911_v41, %v911_v41 }
 0x324   : > { %v903_v44 = vpop.permute.xlu1 %902 }
 0x325   : > { %v912_v46 = vmul.f32 %v903_v44, %v880_v45  ;;  %1366 = vmatmul.mubr.msk.bf16.vlgmr.msra.gmra.mxu1 %vm331_vm0, %v915_v42 }
 0x326   : > { %1376 = vmatpush3.bf16.msra.mxu1 %v1066_v43  ;;  %1377 = vmatprep.mubr.msk.bf16.mxu1 %vm1545_vm1, %v1544_v0 }
 0x327   : > { %v916_v47 = vpack.c.bf16 %v912_v46, %v912_v46 }
 0x328   : > { %v908_v48 = vpop.permute.xlu0 %907 }
 0x329   : > { %v913_v50 = vmul.f32 %v908_v48, %v881_v49  ;;  %1372 = vmatmul.mubr.msk.bf16.vlgmr.msra.gmra.mxu0 %vm331_vm0, %v916_v47 }
 0x32b   : > { %v917_v51 = vpack.c.bf16 %v913_v50, %v913_v50 }
 0x32d   : > { %1378 = vmatmul.mubr.msk.bf16.vlgmr.msra.gmra.mxu1 %vm331_vm0, %v917_v51 }
 0x3e1   : > { %v964_v52 = vpop.f32.mrf.mxu0 }
 0x3e2   : > { %v1109_v60 = vsel %vm1108_vm5, %v964_v52, 0.0 }
 0x3e3   : > { %v1361_v53 = vpop.f32.mrf.mxu0 }
 0x3e5   : > { %v967_v54 = vpop.f32.mrf.mxu0  ;;  %v1010_v55 = vpop.f32.mrf.mxu1 }
 0x3e6   : > { %v1110_v0 = vsel %vm1108_vm5, %v1010_v55, 0.0 }
 0x3e7   : > { %v1362_v56 = vpop.f32.mrf.mxu0  ;;  %v1367_v57 = vpop.f32.mrf.mxu1  ;;  %v1111_v62 = vadd.f32 %v1110_v0, %v1109_v60 }
 0x3e9   : > { %v1013_v58 = vpop.f32.mrf.mxu1  ;;  %v1056_v59 = vpop.f32.mrf.mxu0 }
 0x3ea   : > { %v1112_v61 = vsel %vm1108_vm5, %v1056_v59, 0.0 }
 0x3eb   : > { %v1368_v63 = vpop.f32.mrf.mxu1  ;;  %v1373_v1 = vpop.f32.mrf.mxu0  ;;  %v1113_v2 = vadd.f32 %v1112_v61, %v1111_v62 }
 0x3ed   : > { %v1059_v3 = vpop.f32.mrf.mxu0  ;;  %v1102_v4 = vpop.f32.mrf.mxu1 }
 0x3ee   : > { %v1114_v5 = vsel %vm1108_vm5, %v1102_v4, 0.0 }
 0x3ef   : > { %v1115_v7 = vadd.f32 %v1114_v5, %v1113_v2  ;;  %v1374_v8 = vpop.f32.mrf.mxu0  ;;  %v1379_v9 = vpop.f32.mrf.mxu1 }
 0x3f1   : > { %v1123_v10 = vadd.f32 %v1277_v6, %v1115_v7  ;;  %v1105_v11 = vpop.f32.mrf.mxu1 }
 0x3f3   : > { %v1380_v12 = vpop.f32.mrf.mxu1  ;;  %1124 = vst.msk [vmem:[%s292_s16] sm:$0xff] %vm1108_vm5, %v1123_v10 }
 0x3f4   : > { %1479 = shalt.err (!%p1476_p5)
}
 0x3f5   : > { %s1480_s10 = scalar_lea.hbm %s1839_s27, 128  ;;  %s1484_s13 = scalar_lea.hbm %s1887_s5, 256 }
 0x3f6   : > { %p1481_p6 = scmp.ne.s32.totalorder %s1839_s27, %s1480_s10  ;;  %p1485_p10 = scmp.lt.s32.totalorder %s1839_s27, %s1887_s5 }
 0x3f7   : > { %p1486_p11 = scmp.lt.s32.totalorder %s1484_s13, %s1480_s10 }
 0x3f8   : > { %p1482_p7 = pnand %p1481_p6, %p1619_p4 }
 0x3f9   : > { %p1487_p12 = por %p1486_p11, %p1485_p10 }
 0x3fa   : > { %p1483_p9 = pneg %p1482_p7 }
 0x3fc   : > { %p1488_p13 = pnand %p1487_p12, %p1483_p9 }
 0x3fe   : > { %1491 = shalt.err (!%p1488_p13)
}
 0x3ff   : > { %1381 = dma.vmem_to_hbm [thread:$0]  (%p1619_p4), %s1141_s17, 128, %s1839_s27, %s1126_s29  }
 0x400 PF: > { %p1387_p0 = scmp.ge.s32.totalorder %s1542_s23, 2  ;;  %s1152_s16 = sand.u32 1, %s1522_s18  }
 0x401   : > { %s1153_s24 = scalar_lea.sflag [#allocation6], %s1152_s16 }
 0x402   : > { %p1384_p1 = pnand %p1387_p0, %p1626_p8 }
 0x404   : > { %p1385_p2 = pneg %p1384_p1 }
 0x406   : > { %1517 = dma.done.wait (%p1385_p2), %s1153_s24, 128  }
 0x407   : > { %1519 = vsyncadd (%p1385_p2), %s1153_s24, 4294967168  ;;  %s18_s23 = sadd.s32 1, %s1542_s23   ;;  %s1890_s18 = smov %s1526_s19 }
 0x408   : > { %p15_p3 = scmp.ge.s32.totalorder %s18_s23, 4   ;;  %s1891_s19 = smov %s1530_s20 }
 0x409   : > { %s1892_s20 = smov %s1632_s6  ;;  %s1893_s21 = smov %s1538_s22 }
 0x40a   : > { %s1894_s22 = smov %s1896_s26  ;;  %17 = sbr.rel (!%p15_p3) target bundleno = 4 (0x4), region = 93 }
 0x40f   :  { %1158 = vsyncpa [#allocation6], 1 }
 0x410   :  { %1160 = vsyncpa [#allocation6 + $0x1], 1 }

</bundles_post_ra>
